<compile_context>
chip_gen: v7x
topology: tpu7x:2x2x1
jax: 0.10.0
libtpu: 0.0.40
codegen_flags: <defaults>
</compile_context>

<pallas_src>
import jax
import jax.numpy as jnp
from jax import lax
from jax.experimental import pallas as pl
from jax.experimental.pallas import tpu as pltpu

INPUT_DIM = 20
HIDDEN_DIM = 256
OUT_DIM = 1


def mlp_kernel(x_ref, w1t_ref, w2_ref, o_ref):
    # x: (TB, D_in)  w1t: (D_in, H)  w2: (1, H)  o: (1, 1, TB)
    # fc1 on the MXU, accumulate in f32.
    h = jnp.dot(x_ref[...], w1t_ref[...], preferred_element_type=jnp.float32)
    h = jnp.maximum(h, 0.0)  # ReLU on the VPU
    # fc2: contract H while landing the result on the lane axis:
    #   (1, H) . (TB, H)^T_H -> (1, TB)
    # This is the q@k^T style dot_general (both operands contract their last
    # dim), so the per-tile output comes out lane-major and the store is a
    # full unmasked vst -- no (TB, 1) lane-padded block, no vst.msk.
    y = lax.dot_general(
        w2_ref[...], h,
        dimension_numbers=(((1,), (1,)), ((), ())),
        preferred_element_type=jnp.float32)          # (1, TB)
    o_ref[...] = y[None].astype(o_ref.dtype)         # (1, 1, TB)


def prepare_params(w1, w2):
    """Hoist the fc1 transpose out of the per-call hot path.

    w1: (HIDDEN_DIM, INPUT_DIM) -> w1t (INPUT_DIM, HIDDEN_DIM)
    w2: (OUT_DIM, HIDDEN_DIM)   -> passed through (already a lane-dense row).
    """
    return w1.T, w2


def _round_up(n, m):
    return ((n + m - 1) // m) * m


def nn_toy_forward(x, w1t, w2, *, tile_b=8192):
    """x: (B, INPUT_DIM) f32; w1t: (INPUT_DIM, HIDDEN_DIM); w2: (OUT_DIM, HIDDEN_DIM)."""
    B = x.shape[0]
    # Batch tile: multiple of 8 (sublane), capped at tile_b.  The ragged last
    # tile is handled by Pallas block masking on the x input; extra rows are
    # sliced off the (padded) lane-dense output below.
    tb = min(tile_b, _round_up(B, 8))
    num_tiles = pl.cdiv(B, tb)

    flops = 2 * B * INPUT_DIM * HIDDEN_DIM + 2 * B * HIDDEN_DIM
    bytes_accessed = 4 * (B * INPUT_DIM                       # x read
                          + INPUT_DIM * HIDDEN_DIM            # w1t read
                          + OUT_DIM * HIDDEN_DIM              # w2 read
                          + num_tiles * tb)                   # y write

    out = pl.pallas_call(
        mlp_kernel,
        # Lane-dense output slab: one (1, tb) row per batch tile.
        out_shape=jax.ShapeDtypeStruct((num_tiles, 1, tb), x.dtype),
        grid_spec=pltpu.PrefetchScalarGridSpec(
            num_scalar_prefetch=0,
            grid=(num_tiles,),
            in_specs=[
                # x: tiled along batch, software-pipelined by Pallas.
                pl.BlockSpec((tb, INPUT_DIM), lambda i: (i, 0)),
                # Weights: constant block index -> resident in VMEM.
                pl.BlockSpec((INPUT_DIM, HIDDEN_DIM), lambda i: (0, 0)),
                pl.BlockSpec((OUT_DIM, HIDDEN_DIM), lambda i: (0, 0)),
            ],
            out_specs=pl.BlockSpec((1, 1, tb), lambda i: (i, 0, 0)),
        ),
        compiler_params=pltpu.CompilerParams(
            # Batch tiles are independent -> megacore sharding on v7x
            # (neutral on v5e/v6e single-TC chips).
            dimension_semantics=("parallel",),
        ),
        cost_estimate=pl.CostEstimate(
            flops=flops, transcendentals=0, bytes_accessed=bytes_accessed),
    )(x, w1t, w2)

    # (num_tiles, 1, tb) lane-major -> (B, 1); drop ragged-tile padding rows.
    return out.reshape(-1)[:B].reshape(B, OUT_DIM)


def init_params(key):
    """Deterministic init mimicking PyTorch nn.Linear default:
    U(-1/sqrt(fan_in), 1/sqrt(fan_in))."""
    k1, k2 = jax.random.split(key)
    bound1 = 1.0 / jnp.sqrt(float(INPUT_DIM))
    bound2 = 1.0 / jnp.sqrt(float(HIDDEN_DIM))
    w1 = jax.random.uniform(k1, (HIDDEN_DIM, INPUT_DIM), jnp.float32,
                            minval=-bound1, maxval=bound1)
    w2 = jax.random.uniform(k2, (OUT_DIM, HIDDEN_DIM), jnp.float32,
                            minval=-bound2, maxval=bound2)
    return w1, w2


def _reference(x, w1, w2):
    # Same math as the PyTorch module; fc2 written elementwise so the check is
    # not polluted by matmul precision on the reference side.
    h = jnp.maximum(x @ w1.T, 0.0)
    return jnp.sum(h * w2, axis=-1, keepdims=True)


if __name__ == "__main__":
    key = jax.random.PRNGKey(0)
    k_x, k_p = jax.random.split(key)

    w1, w2 = init_params(k_p)
    w1t, w2_row = prepare_params(w1, w2)

    # Case 1: B a multiple of the tile, small tile so grid > 1 (exercises the
    # pipelined path and the lane-dense writeback).
    B = 64
    x = jax.random.normal(k_x, (B, INPUT_DIM), jnp.float32)
    y = jax.block_until_ready(nn_toy_forward(x, w1t, w2_row, tile_b=16))
    y_ref = _reference(x, w1, w2)
    assert y.shape == (B, OUT_DIM)
    assert jnp.allclose(y, y_ref, atol=1e-3, rtol=1e-3), \
        float(jnp.max(jnp.abs(y - y_ref)))

    # Case 2: ragged batch (B not a multiple of the tile) -> masked last x
    # tile; safe because rows are independent and the wrapper slices to B.
    B2 = 20
    x2 = jax.random.normal(jax.random.fold_in(k_x, 1), (B2, INPUT_DIM), jnp.float32)
    y2 = jax.block_until_ready(nn_toy_forward(x2, w1t, w2_row, tile_b=16))
    y2_ref = _reference(x2, w1, w2)
    assert y2.shape == (B2, OUT_DIM)
    assert jnp.allclose(y2, y2_ref, atol=1e-3, rtol=1e-3), \
        float(jnp.max(jnp.abs(y2 - y2_ref)))

    print("KERNEL_OK")
</pallas_src>

<mosaic_0001>
module attributes {stable_mosaic.version = 11 : i64} {
  func.func @mlp_kernel(%arg0: i32, %arg1: memref<16x20xf32, #tpu.memory_space<vmem>>, %arg2: memref<20x256xf32, #tpu.memory_space<vmem>>, %arg3: memref<1x256xf32, #tpu.memory_space<vmem>>, %arg4: memref<1x1x16xf32, #tpu.memory_space<vmem>>) attributes {dimension_semantics = [#tpu.dimension_semantics<parallel>], iteration_bounds = array<i64: 4>, scalar_prefetch = 0 : i64, scratch_operands = 0 : i64, tpu.core_type = #tpu.core_type<tc>, window_params = [{transform_indices = @transform_0, window_bounds = array<i64: 16, 20>}, {pipeline_mode = #tpu.pipeline_mode<synchronous>, transform_indices = @transform_1, window_bounds = array<i64: 20, 256>}, {pipeline_mode = #tpu.pipeline_mode<synchronous>, transform_indices = @transform_2, window_bounds = array<i64: 1, 256>}, {transform_indices = @transform_3, window_bounds = array<i64: 1, 1, 16>}]} {
    %c0 = arith.constant 0 : index
    %c0_0 = arith.constant 0 : index
    %0 = vector.load %arg1[%c0, %c0_0] : memref<16x20xf32, #tpu.memory_space<vmem>>, vector<16x20xf32>
    %c0_1 = arith.constant 0 : index
    %c0_2 = arith.constant 0 : index
    %1 = vector.load %arg2[%c0_1, %c0_2] : memref<20x256xf32, #tpu.memory_space<vmem>>, vector<20x256xf32>
    %cst = arith.constant dense<0.000000e+00> : vector<16x256xf32>
    %2 = tpu.matmul %0, %1, %cst {dimension_numbers = #tpu.dot_dimension_numbers<[1], [0], [0], [1], [0, 0, 1, 1], [], []>} : vector<16x20xf32>, vector<20x256xf32>, vector<16x256xf32> -> vector<16x256xf32>
    %cst_3 = arith.constant 0.000000e+00 : f32
    %3 = vector.broadcast %cst_3 : f32 to vector<16x256xf32>
    %4 = arith.maximumf %2, %3 : vector<16x256xf32>
    %c0_4 = arith.constant 0 : index
    %c0_5 = arith.constant 0 : index
    %5 = vector.load %arg3[%c0_4, %c0_5] : memref<1x256xf32, #tpu.memory_space<vmem>>, vector<1x256xf32>
    %cst_6 = arith.constant dense<0.000000e+00> : vector<1x16xf32>
    %6 = tpu.matmul %5, %4, %cst_6 {dimension_numbers = #tpu.dot_dimension_numbers<[1], [1], [0], [0], [0, 0, 1, 0], [], []>} : vector<1x256xf32>, vector<16x256xf32>, vector<1x16xf32> -> vector<1x16xf32>
    %7 = vector.shape_cast %6 : vector<1x16xf32> to vector<1x1x16xf32>
    %c0_7 = arith.constant 0 : index
    %c0_8 = arith.constant 0 : index
    %c0_9 = arith.constant 0 : index
    %8 = vector.load %arg4[%c0_7, %c0_8, %c0_9] : memref<1x1x16xf32, #tpu.memory_space<vmem>>, vector<1x1x16xf32>
    tpu.vector_store %arg4[%c0_7, %c0_8, %c0_9], %7 {strides = array<i32>} : memref<1x1x16xf32, #tpu.memory_space<vmem>>, vector<1x1x16xf32>,
    return
  }
  func.func @transform_0(%arg0: i32) -> (i32, i32) {
    %c0_i32 = arith.constant 0 : i32
    %c0_i32_0 = arith.constant 0 : i32
    return %arg0, %c0_i32 : i32, i32
  }
  func.func @transform_1(%arg0: i32) -> (i32, i32) {
    %c0_i32 = arith.constant 0 : i32
    %c0_i32_0 = arith.constant 0 : i32
    %c0_i32_1 = arith.constant 0 : i32
    return %c0_i32, %c0_i32_0 : i32, i32
  }
  func.func @transform_2(%arg0: i32) -> (i32, i32) {
    %c0_i32 = arith.constant 0 : i32
    %c0_i32_0 = arith.constant 0 : i32
    %c0_i32_1 = arith.constant 0 : i32
    return %c0_i32, %c0_i32_0 : i32, i32
  }
  func.func @transform_3(%arg0: i32) -> (i32, i32, i32) {
    %c0_i32 = arith.constant 0 : i32
    %c0_i32_0 = arith.constant 0 : i32
    %c0_i32_1 = arith.constant 0 : i32
    return %arg0, %c0_i32, %c0_i32_0 : i32, i32, i32
  }
}

</mosaic_0001>

<bundles_post_ra>
// kernel: tpu_custom_call.1
= control target key start
LH: loop header
LB: loop body
LE: loop exit
PB: predicated region body
PF: predicated region fallthrough
CT: control target
= control target key end

     0   :  { %8 = vsyncpa [#allocation3], 0  ;;  %s692_s0 = inlined_call_operand.vmem [shape: f32[64,20], index: 0, kind: input, shape index: {}]   ;;  %s693_s1 = inlined_call_operand.vmem [shape: f32[20,256], index: 1, kind: input, shape index: {}]   ;;  %s694_s2 = inlined_call_operand.vmem [shape: f32[1,256], index: 2, kind: input, shape index: {}]   ;;  %s695_s3 = inlined_call_operand.hbm [shape: f32[4,1,16], index: 3, kind: output, shape index: {}]  }
   0x1   :  { %10 = vsyncpa [#allocation3 + $0x1], 0  ;;  %s572_s12 = smov 0   ;;  %s574_s13 = smov 0  }
   0x2   :  { %s576_s14 = smov 0   ;;  %s578_s15 = smov 0  }
   0x3 LB: > { %s593_s16 = sadd.s32 4294967295, %s548_s15   ;;  %s425_s17 = sadd.s32 4294967294, %s548_s15   ;;  %s548_s15 = sphi %s578_s15, %s701_s15   ;;  %s544_s14 = sphi %s576_s14, %s700_s14   ;;  %s540_s13 = sphi %s574_s13, %s699_s13   ;;  %s536_s12 = sphi %s572_s12, %s698_s12  }
   0x4   : > { %s597_s18 = sadd.s32 1, %s548_s15   ;;  %s91_s19 = sadd.s32 1, %s544_s14 }
   0x5   : > { %s88_s20 = ssub.s32 %s548_s15, %s597_s18  ;;  %p101_p0 = scmp.ne.s32.totalorder %s544_s14, %s540_s13 }
   0x6   : > { %p89_p1 = scmp.eq.s32.totalorder %s88_s20, 0  ;;  %p102_p2 = scmp.eq.s32.totalorder %s593_s16, 3 }
   0x7   : > { %p107_p3 = scmp.ne.s32.totalorder %s540_s13, %s536_s12  ;;  %p108_p4 = scmp.eq.s32.totalorder %s425_s17, 3 }
   0x8   : > { %s608_s21 = scalar_select %p89_p1, %s544_s14, %s91_s19  }
   0x9   : > { %p610_p5 = por %p102_p2, %p101_p0  ;;  %p614_p6 = por %p108_p4, %p107_p3 }
   0xa   : > { %p428_p7 = scmp.ge.s32.totalorder %s548_s15, 1  ;;  %p141_p8 = scmp.lt.s32.totalorder %s548_s15, 5 }
   0xc   : > { %p142_p9 = pnand %p428_p7, %p141_p8 }
   0xd   : > { %v173_v0 = vld [vmem:[%s693_s1 + $0x8] sm:$0xff] (!%p142_p9)  ;;  %v175_v1 = vld [vmem:[%s693_s1 + $0x18] sm:$0xff] (!%p142_p9)  ;;  %v172_v2 = vld [vmem:[%s693_s1] sm:$0xff] (!%p142_p9)  ;;  %s429_s30 = sshll.u32 (!%p142_p9), %s593_s16, 1  ;;  %v550_v5 = vmov (!%p142_p9), 0.0   ;;  %vm185_vm0 = vcmask (!%p142_p9), 1043456   ;;  %v275_v11 = vlaneseq (!%p142_p9) }
   0xe   : > { %145 = sbr.rel (%p142_p9) target bundleno = 480 (0x1e0), region = 32  ;;  %v438_v3 = vpack.c.bf16 (!%p142_p9), %v175_v1, %v173_v0  ;;  %v174_v4 = vld [vmem:[%s693_s1 + $0x10] sm:$0xff] (!%p142_p9)  ;;  %256 = vmatprep.mubr.f32.mxu0 (!%p142_p9), %v550_v5  ;;  %p165_p10 = scmp.lt.s32.totalorder (!%p142_p9), %s429_s30, 7  ;;  %v177_v7 = vld [vmem:[%s693_s1 + $0x28] sm:$0xf] (!%p142_p9)  ;;  %vm178_vm1 = vcmask (!%p142_p9), 162816  }
   0xf   : > { %v440_v6 = vpack.c.bf16 (!%p142_p9), %v174_v4, %v172_v2  ;;  %v176_v8 = vld [vmem:[%s693_s1 + $0x20] sm:$0xf] (!%p142_p9)  ;;  %v276_v12 = vshrl.u32 (!%p142_p9), %v275_v11, 7  ;;  %s162_s25 = sand.u32 (!%p142_p9), 1, %s540_s13   ;;  %s435_s26 = sshll.u32 (!%p142_p9), %s593_s16, 4  ;;  %vm355_vm2 = vcmask (!%p142_p9), 122880  }
  0x10   : > { %439 = vmatprep.subr.bf16.mxu0 (!%p142_p9), %v438_v3  ;;  %v273_v13 = vld [vmem:[%s694_s2] sm:$0x3] (!%p142_p9)  ;;  %s163_s27 = scalar_lea.vmem (!%p142_p9), [#allocation2], %s162_s25  ;;  %s650_s4 = scalar_lea.hbm (!%p142_p9), %s695_s3, %s435_s26 }
  0x11   : > { %441 = vmatpush1.bf16.msra.mxu0 (!%p142_p9), %v440_v6  ;;  %v277_v14 = vsub.s32 (!%p142_p9), 0, %v276_v12  ;;  %v281_v15 = vsub.s32 (!%p142_p9), 1, %v276_v12  ;;  %s370_s28 = sshll.u32 (!%p142_p9), %s163_s27, 4  ;;  %s358_s5 = scalar_lea.sflag (!%p142_p9), [#allocation3], %s162_s25  ;;  %s652_s28 = int_to_ptr.vmem [resolvable:$true] %s370_s28 }
  0x12   : > { %431 = vmatprep.subr.msk.mxu0 (!%p142_p9), %vm185_vm0, %v177_v7  ;;  %s486_s6 = scalar_lea.vmem (!%p142_p9), %s652_s28, 16  ;;  %s551_s16 = smov (!%p142_p9), [#allocation2]  }
  0x13   : > { %v278_v16 = vrot.slane (!%p142_p9), %v273_v13, %v277_v14  ;;  %v282_v17 = vrot.slane (!%p142_p9), %v273_v13, %v281_v15  ;;  %p487_p11 = scmp.ne.s32.totalorder (!%p142_p9), %s652_s28, %s486_s6  ;;  %s490_s7 = sshll.u32 (!%p142_p9), %s551_s16, 4  ;;  %s491_s7 = int_to_ptr.vmem [resolvable:$false] %s490_s7 }
  0x14   : > { %s492_s8 = scalar_lea.vmem (!%p142_p9), %s491_s7, 32  ;;  %p493_p0 = scmp.lt.s32.totalorder (!%p142_p9), %s652_s28, %s491_s7 }
  0x15   : > { %s703_s30 = smov (!%p165_p10, %s429_s30), 7  ;;  %432 = vmatpush1.msk.msra.mxu0 %vm185_vm0, %v176_v8  ;;  %349 = vmatprep.mubr.f32.mxu1 %v282_v17  ;;  %p488_p12 = pnand %p487_p11, %p610_p5 }
  0x16   : > { %s430_s10 = sshll.u32 %s703_s30, 3  ;;  %p494_p1 = scmp.lt.s32.totalorder %s492_s8, %s486_s6 }
  0x17   : > { %s168_s19 = scalar_lea.vmem %s692_s0, %s430_s10  ;;  %p489_p13 = pneg %p488_p12 }
  0x18   : > { %v170_v9 = vld [vmem:[%s168_s19] sm:$0xff]  ;;  %v171_v10 = vld [vmem:[%s168_s19 + $0x8] sm:$0xff]  ;;  %p495_p2 = por %p494_p1, %p493_p0 }
  0x19   : > { %433 = vmatmul.mubr.msk.f32.vlgmr.msra.gmra.mrb[0].mxu0 %vm178_vm1, %v170_v9 }
  0x1a   : > { %262 = vmatprep.mubr.f32.mxu0 %v550_v5  ;;  %p496_p3 = pnand %p495_p2, %p489_p13 }
  0x1d   : > { %434 = vmatmul.mubr.msk.f32.gmra.mrb[2].mxu0 %vm178_vm1, %v171_v10 }
  0xec   : > { %v258_v18 = vpop.f32.mrb[0].mxu0 }
  0xed   : > { %v260_v19 = vpop.f32.mrb[1].mxu0  ;;  %v269_v21 = vmax.f32 %v258_v18, 0.0 }
  0xee   : > { %v270_v24 = vmax.f32 %v260_v19, 0.0 }
  0xf0   : > { %v264_v20 = vpop.f32.mrb[2].mxu0 }
  0xf1   : > { %v271_v22 = vmax.f32 %v264_v20, 0.0  ;;  %v266_v23 = vpop.f32.mrb[3].mxu0 }
  0xf2   : > { %v272_v25 = vmax.f32 %v266_v23, 0.0 }
  0xf3   : > { %v444_v26 = vpack.c.bf16 %v271_v22, %v269_v21 }
  0xf4   : > { %v442_v27 = vpack.c.bf16 %v272_v25, %v270_v24 }
  0xf6   : > { %443 = vmatprep.subr.bf16.mxu1 %v442_v27 }
  0xf7   : > { %445 = vmatpush1.bf16.xpose.msra.mxu1 %v444_v26 }
  0xfe   : > { %350 = vmatmul.mubr.f32.vlgmr.msra.gmra.mrb[0].mxu1 %v278_v16 }
 0x1d1   : > { %v351_v28 = vpop.f32.mrb[0].mxu1 }
 0x1d2   : > { %356 = vst.msk [vmem:[%s163_s27] sm:$0x1] %vm355_vm2, %v351_v28  ;;  %v353_v29 = vpop.f32.mrb[1].mxu1 }
 0x1d3   : > { %499 = shalt.err (!%p496_p3)
}
 0x1d4   : > { %s500_s9 = scalar_lea.hbm %s650_s4, 16  ;;  %s504_s17 = scalar_lea.hbm %s695_s3, 64 }
 0x1d5   : > { %p501_p4 = scmp.ne.s32.totalorder %s650_s4, %s500_s9  ;;  %p505_p9 = scmp.lt.u32.totalorder %s650_s4, %s695_s3 }
 0x1d6   : > { %p506_p10 = scmp.lt.u32.totalorder %s504_s17, %s500_s9  ;;  %p508_p12 = scmp.lt.u32.totalorder %s500_s9, %s650_s4 }
 0x1d7   : > { %p502_p7 = pnand %p501_p4, %p610_p5 }
 0x1d8   : > { %p507_p11 = por %p506_p10, %p505_p9 }
 0x1d9   : > { %p503_p8 = pneg %p502_p7 }
 0x1da   : > { %p509_p13 = por %p508_p12, %p507_p11 }
 0x1dc   : > { %p510_p0 = pnand %p509_p13, %p503_p8 }
 0x1de   : > { %513 = shalt.err (!%p510_p0)
}
 0x1df   : > { %446 = dma.vmem_to_hbm [thread:$0]  (%p610_p5), %s652_s28, 16, %s650_s4, %s358_s5  }
 0x1e0 PF: > { %p452_p1 = scmp.ge.s32.totalorder %s548_s15, 2  ;;  %s382_s24 = sand.u32 1, %s536_s12  }
 0x1e1   : > { %s383_s25 = scalar_lea.sflag [#allocation3], %s382_s24 }
 0x1e2   : > { %p449_p2 = pnand %p452_p1, %p614_p6 }
 0x1e4   : > { %531 = dma.done.wait (!%p449_p2), %s383_s25, 16  }
 0x1e5   : > { %533 = vsyncadd (!%p449_p2), %s383_s25, 4294967280  ;;  %p13_p3 = scmp.ge.s32.totalorder %s597_s18, 6   ;;  %s698_s12 = smov %s540_s13 }
 0x1e6   : > { %s699_s13 = smov %s544_s14  ;;  %s700_s14 = smov %s608_s21 }
 0x1e7   : > { %s701_s15 = smov %s597_s18  ;;  %15 = sbr.rel (!%p13_p3) target bundleno = 3 (0x3), region = 67 }
 0x1ee   :  { %387 = vsyncpa [#allocation3], 1 }
 0x1ef   :  { %389 = vsyncpa [#allocation3 + $0x1], 1 }

</bundles_post_ra>
